<compile_context>
chip_gen: v6e
topology: v6e:2x2x1
jax: 0.10.0
libtpu: 0.0.40
codegen_flags: <defaults>
</compile_context>

<pallas_src>
import jax
import jax.numpy as jnp
from jax.experimental import pallas as pl
from jax.experimental.pallas import tpu as pltpu

_LANE = 128
_SUBLANE = 8


def _round_up(x, m):
    return ((x + m - 1) // m) * m


def _pad_rows(x, rows):
    if x.shape[0] == rows:
        return x
    return jnp.pad(x, ((0, rows - x.shape[0]), (0, 0)))


# ---------------------------------------------------------------------------
# Kernels
# ---------------------------------------------------------------------------
def _linear_kernel(s_ref, ns_ref, wa_ref, wb_ref, b_ref, o_ref):
    # s,ns: [TB, S] f32; wa,wb: [S, AP] bf16; b: [1, AP] f32 -> o: [TB, AP] f32
    s = s_ref[...].astype(jnp.bfloat16)
    ns = ns_ref[...].astype(jnp.bfloat16)
    acc = jnp.dot(s, wa_ref[...], preferred_element_type=jnp.float32)
    acc += jnp.dot(ns, wb_ref[...], preferred_element_type=jnp.float32)
    o_ref[...] = (acc + b_ref[...]).astype(o_ref.dtype)


def _mlp_kernel(s_ref, ns_ref, w1a_ref, w1b_ref, b1_ref, w2_ref, b2_ref,
                w3_ref, b3_ref, o_ref):
    # fused concat: first layer = s @ w1_top + ns @ w1_bot  (two half-K matmuls)
    s = s_ref[...].astype(jnp.bfloat16)
    ns = ns_ref[...].astype(jnp.bfloat16)
    h1 = jnp.dot(s, w1a_ref[...], preferred_element_type=jnp.float32)
    h1 += jnp.dot(ns, w1b_ref[...], preferred_element_type=jnp.float32)
    h1 = jnp.maximum(h1 + b1_ref[...], 0.0)                       # f32 bias/ReLU
    h2 = jnp.dot(h1.astype(w2_ref.dtype), w2_ref[...],
                 preferred_element_type=jnp.float32)
    h2 = jnp.maximum(h2 + b2_ref[...], 0.0)
    o = jnp.dot(h2.astype(w3_ref.dtype), w3_ref[...],
                preferred_element_type=jnp.float32)
    o_ref[...] = (o + b3_ref[...]).astype(o_ref.dtype)


# ---------------------------------------------------------------------------
# Wrappers
# ---------------------------------------------------------------------------
def _batch_tiling(B, batch_tile):
    TB = min(batch_tile, _round_up(B, _SUBLANE))   # multiple of 8 sublanes
    Bp = _round_up(B, TB)
    return TB, Bp


def inverse_model_linear(state, next_state, w, b, *, batch_tile=512):
    """inverse_net = Linear(2*state_dim -> action_dim).  w: [2S, A], b: [A]."""
    B, S = state.shape
    A = w.shape[1]
    AP = _round_up(max(A, 1), _LANE)               # lane-dense (128-padded) output

    # split for fused concat + pad N to 128 lanes; bf16 matmul weights (constants)
    wa = jnp.pad(w[:S], ((0, 0), (0, AP - A))).astype(jnp.bfloat16)
    wb = jnp.pad(w[S:], ((0, 0), (0, AP - A))).astype(jnp.bfloat16)
    bp = jnp.pad(b.astype(jnp.float32), (0, AP - A)).reshape(1, AP)

    TB, Bp = _batch_tiling(B, batch_tile)
    s_p = _pad_rows(state.astype(jnp.float32), Bp)
    ns_p = _pad_rows(next_state.astype(jnp.float32), Bp)

    batch_map = lambda i: (i, 0)
    const_map = lambda i: (0, 0)

    flops = 2 * Bp * (2 * S) * AP
    bytes_acc = 2 * Bp * S * 4 + 2 * S * AP * 2 + AP * 4 + Bp * AP * 4

    out = pl.pallas_call(
        _linear_kernel,
        out_shape=jax.ShapeDtypeStruct((Bp, AP), jnp.float32),
        grid_spec=pltpu.PrefetchScalarGridSpec(
            num_scalar_prefetch=0,
            grid=(Bp // TB,),
            in_specs=[
                pl.BlockSpec((TB, S), batch_map),
                pl.BlockSpec((TB, S), batch_map),
                pl.BlockSpec((S, AP), const_map),   # weights stay VMEM-resident
                pl.BlockSpec((S, AP), const_map),
                pl.BlockSpec((1, AP), const_map),
            ],
            out_specs=pl.BlockSpec((TB, AP), batch_map),
        ),
        compiler_params=pltpu.CompilerParams(
            dimension_semantics=("parallel",)),
        cost_estimate=pl.CostEstimate(
            flops=flops, transcendentals=0, bytes_accessed=bytes_acc),
    )(s_p, ns_p, wa, wb, bp)
    return out[:B, :A]


def inverse_model_mlp(state, next_state, params, *, batch_tile=512):
    """inverse_net = MLP(2*state_dim -> n_hidden -> n_hidden -> action_dim)."""
    w1, b1, w2, b2, w3, b3 = params                # w*: [in, out]
    B, S = state.shape
    H = w1.shape[1]
    A = w3.shape[1]
    AP = _round_up(max(A, 1), _LANE)

    w1a = w1[:S].astype(jnp.bfloat16)              # fused-concat split
    w1b = w1[S:].astype(jnp.bfloat16)
    w2b = w2.astype(jnp.bfloat16)
    w3p = jnp.pad(w3, ((0, 0), (0, AP - A))).astype(jnp.bfloat16)
    b1r = b1.astype(jnp.float32).reshape(1, H)
    b2r = b2.astype(jnp.float32).reshape(1, H)
    b3p = jnp.pad(b3.astype(jnp.float32), (0, AP - A)).reshape(1, AP)

    TB, Bp = _batch_tiling(B, batch_tile)
    s_p = _pad_rows(state.astype(jnp.float32), Bp)
    ns_p = _pad_rows(next_state.astype(jnp.float32), Bp)

    batch_map = lambda i: (i, 0)
    const_map = lambda i: (0, 0)

    flops = 2 * Bp * (2 * S * H + H * H + H * AP)
    bytes_acc = (2 * Bp * S * 4 + (2 * S * H + H * H + H * AP) * 2
                 + (2 * H + AP) * 4 + Bp * AP * 4)

    out = pl.pallas_call(
        _mlp_kernel,
        out_shape=jax.ShapeDtypeStruct((Bp, AP), jnp.float32),
        grid_spec=pltpu.PrefetchScalarGridSpec(
            num_scalar_prefetch=0,
            grid=(Bp // TB,),
            in_specs=[
                pl.BlockSpec((TB, S), batch_map),
                pl.BlockSpec((TB, S), batch_map),
                pl.BlockSpec((S, H), const_map),
                pl.BlockSpec((S, H), const_map),
                pl.BlockSpec((1, H), const_map),
                pl.BlockSpec((H, H), const_map),
                pl.BlockSpec((1, H), const_map),
                pl.BlockSpec((H, AP), const_map),
                pl.BlockSpec((1, AP), const_map),
            ],
            out_specs=pl.BlockSpec((TB, AP), batch_map),
        ),
        compiler_params=pltpu.CompilerParams(
            dimension_semantics=("parallel",)),
        cost_estimate=pl.CostEstimate(
            flops=flops, transcendentals=0, bytes_accessed=bytes_acc),
    )(s_p, ns_p, w1a, w1b, b1r, w2b, b2r, w3p, b3p)
    return out[:B, :A]


# ---------------------------------------------------------------------------
# References (match the kernel's bf16-matmul / f32-accumulate recipe)
# ---------------------------------------------------------------------------
def _bf16_dot(x, w):
    return jnp.dot(x.astype(jnp.bfloat16), w.astype(jnp.bfloat16),
                   preferred_element_type=jnp.float32)


def _ref_linear(state, next_state, w, b):
    S = state.shape[1]
    return _bf16_dot(state, w[:S]) + _bf16_dot(next_state, w[S:]) + b


def _ref_mlp(state, next_state, params):
    w1, b1, w2, b2, w3, b3 = params
    S = state.shape[1]
    h = jnp.maximum(_bf16_dot(state, w1[:S]) + _bf16_dot(next_state, w1[S:]) + b1, 0.0)
    h = jnp.maximum(_bf16_dot(h, w2) + b2, 0.0)
    return _bf16_dot(h, w3) + b3


# ---------------------------------------------------------------------------
# Deterministic parameter init (PyTorch nn.Linear-like uniform init)
# ---------------------------------------------------------------------------
def _init_linear(key, fan_in, fan_out):
    kw, kb = jax.random.split(key)
    bound = 1.0 / jnp.sqrt(fan_in)
    # stored as [in, out] (transpose of torch's [out, in]) for the kernel matmul
    w = jax.random.uniform(kw, (fan_in, fan_out), jnp.float32, -bound, bound)
    b = jax.random.uniform(kb, (fan_out,), jnp.float32, -bound, bound)
    return w, b


if __name__ == "__main__":
    key = jax.random.PRNGKey(0)
    batch = 8
    state_dim = 32
    action_dim = 4
    n_hidden = 128

    k_s, k_ns, k_lin, k1, k2, k3 = jax.random.split(key, 6)
    state = jax.random.normal(k_s, (batch, state_dim), jnp.float32)
    next_state = jax.random.normal(k_ns, (batch, state_dim), jnp.float32)

    # ---- model_type='linear' (default) ----
    w_lin, b_lin = _init_linear(k_lin, 2 * state_dim, action_dim)
    out_lin = jax.block_until_ready(
        inverse_model_linear(state, next_state, w_lin, b_lin))
    ref_lin = _ref_linear(state, next_state, w_lin, b_lin)
    ref_lin_f32 = jnp.concatenate([state, next_state], axis=1) @ w_lin + b_lin
    assert out_lin.shape == (batch, action_dim)
    assert jnp.allclose(out_lin, ref_lin, atol=2e-3, rtol=2e-3)
    assert float(jnp.max(jnp.abs(out_lin - ref_lin_f32))) < 0.25  # bf16 sanity

    # ---- model_type='mlp' ----
    w1, b1 = _init_linear(k1, 2 * state_dim, n_hidden)
    w2, b2 = _init_linear(k2, n_hidden, n_hidden)
    w3, b3 = _init_linear(k3, n_hidden, action_dim)
    params = (w1, b1, w2, b2, w3, b3)
    out_mlp = jax.block_until_ready(inverse_model_mlp(state, next_state, params))
    ref_mlp = _ref_mlp(state, next_state, params)
    h_f32 = jnp.maximum(jnp.concatenate([state, next_state], 1) @ w1 + b1, 0.0)
    h_f32 = jnp.maximum(h_f32 @ w2 + b2, 0.0)
    ref_mlp_f32 = h_f32 @ w3 + b3
    assert out_mlp.shape == (batch, action_dim)
    assert jnp.allclose(out_mlp, ref_mlp, atol=2e-3, rtol=2e-3)
    assert float(jnp.max(jnp.abs(out_mlp - ref_mlp_f32))) < 0.25  # bf16 sanity

    # TODO(synk): BaseInverseModel.forward()/getStates() raise NotImplementedError
    # in the PyTorch source; only inverseModel() has concrete compute (above).
    print("KERNEL_OK")
</pallas_src>

<mosaic_0001>
module attributes {stable_mosaic.version = 11 : i64} {
  func.func @_linear_kernel(%arg0: i32, %arg1: memref<8x32xf32, #tpu.memory_space<vmem>>, %arg2: memref<8x32xf32, #tpu.memory_space<vmem>>, %arg3: memref<32x128xbf16, #tpu.memory_space<vmem>>, %arg4: memref<32x128xbf16, #tpu.memory_space<vmem>>, %arg5: memref<1x128xf32, #tpu.memory_space<vmem>>, %arg6: memref<8x128xf32, #tpu.memory_space<vmem>>) attributes {dimension_semantics = [#tpu.dimension_semantics<parallel>], iteration_bounds = array<i64: 1>, scalar_prefetch = 0 : i64, scratch_operands = 0 : i64, tpu.core_type = #tpu.core_type<tc>, window_params = [{transform_indices = @transform_0, window_bounds = array<i64: 8, 32>}, {transform_indices = @transform_1, window_bounds = array<i64: 8, 32>}, {pipeline_mode = #tpu.pipeline_mode<synchronous>, transform_indices = @transform_2, window_bounds = array<i64: 32, 128>}, {pipeline_mode = #tpu.pipeline_mode<synchronous>, transform_indices = @transform_3, window_bounds = array<i64: 32, 128>}, {pipeline_mode = #tpu.pipeline_mode<synchronous>, transform_indices = @transform_4, window_bounds = array<i64: 1, 128>}, {transform_indices = @transform_5, window_bounds = array<i64: 8, 128>}]} {
    %c0 = arith.constant 0 : index
    %c0_0 = arith.constant 0 : index
    %0 = vector.load %arg1[%c0, %c0_0] : memref<8x32xf32, #tpu.memory_space<vmem>>, vector<8x32xf32>
    %1 = arith.truncf %0 : vector<8x32xf32> to vector<8x32xbf16>
    %c0_1 = arith.constant 0 : index
    %c0_2 = arith.constant 0 : index
    %2 = vector.load %arg2[%c0_1, %c0_2] : memref<8x32xf32, #tpu.memory_space<vmem>>, vector<8x32xf32>
    %3 = arith.truncf %2 : vector<8x32xf32> to vector<8x32xbf16>
    %c0_3 = arith.constant 0 : index
    %c0_4 = arith.constant 0 : index
    %4 = vector.load %arg3[%c0_3, %c0_4] : memref<32x128xbf16, #tpu.memory_space<vmem>>, vector<32x128xbf16>
    %cst = arith.constant dense<0.000000e+00> : vector<8x128xf32>
    %5 = tpu.matmul %1, %4, %cst {dimension_numbers = #tpu.dot_dimension_numbers<[1], [0], [0], [1], [0, 0, 1, 1], [], []>} : vector<8x32xbf16>, vector<32x128xbf16>, vector<8x128xf32> -> vector<8x128xf32>
    %c0_5 = arith.constant 0 : index
    %c0_6 = arith.constant 0 : index
    %6 = vector.load %arg4[%c0_5, %c0_6] : memref<32x128xbf16, #tpu.memory_space<vmem>>, vector<32x128xbf16>
    %cst_7 = arith.constant dense<0.000000e+00> : vector<8x128xf32>
    %7 = tpu.matmul %3, %6, %cst_7 {dimension_numbers = #tpu.dot_dimension_numbers<[1], [0], [0], [1], [0, 0, 1, 1], [], []>} : vector<8x32xbf16>, vector<32x128xbf16>, vector<8x128xf32> -> vector<8x128xf32>
    %8 = arith.addf %5, %7 : vector<8x128xf32>
    %c0_8 = arith.constant 0 : index
    %c0_9 = arith.constant 0 : index
    %9 = vector.load %arg5[%c0_8, %c0_9] : memref<1x128xf32, #tpu.memory_space<vmem>>, vector<1x128xf32>
    %10 = vector.broadcast %9 : vector<1x128xf32> to vector<8x128xf32>
    %11 = arith.addf %8, %10 : vector<8x128xf32>
    %c0_10 = arith.constant 0 : index
    %c0_11 = arith.constant 0 : index
    %12 = vector.load %arg6[%c0_10, %c0_11] : memref<8x128xf32, #tpu.memory_space<vmem>>, vector<8x128xf32>
    tpu.vector_store %arg6[%c0_10, %c0_11], %11 {strides = array<i32>} : memref<8x128xf32, #tpu.memory_space<vmem>>, vector<8x128xf32>,
    return
  }
  func.func @transform_0(%arg0: i32) -> (i32, i32) {
    %c0_i32 = arith.constant 0 : i32
    %c0_i32_0 = arith.constant 0 : i32
    return %arg0, %c0_i32 : i32, i32
  }
  func.func @transform_1(%arg0: i32) -> (i32, i32) {
    %c0_i32 = arith.constant 0 : i32
    %c0_i32_0 = arith.constant 0 : i32
    return %arg0, %c0_i32 : i32, i32
  }
  func.func @transform_2(%arg0: i32) -> (i32, i32) {
    %c0_i32 = arith.constant 0 : i32
    %c0_i32_0 = arith.constant 0 : i32
    %c0_i32_1 = arith.constant 0 : i32
    return %c0_i32, %c0_i32_0 : i32, i32
  }
  func.func @transform_3(%arg0: i32) -> (i32, i32) {
    %c0_i32 = arith.constant 0 : i32
    %c0_i32_0 = arith.constant 0 : i32
    %c0_i32_1 = arith.constant 0 : i32
    return %c0_i32, %c0_i32_0 : i32, i32
  }
  func.func @transform_4(%arg0: i32) -> (i32, i32) {
    %c0_i32 = arith.constant 0 : i32
    %c0_i32_0 = arith.constant 0 : i32
    %c0_i32_1 = arith.constant 0 : i32
    return %c0_i32, %c0_i32_0 : i32, i32
  }
  func.func @transform_5(%arg0: i32) -> (i32, i32) {
    %c0_i32 = arith.constant 0 : i32
    %c0_i32_0 = arith.constant 0 : i32
    return %arg0, %c0_i32 : i32, i32
  }
}

</mosaic_0001>

<bundles_post_ra>
// kernel: tpu_custom_call.1
= control target key start
LH: loop header
LB: loop body
LE: loop exit
PB: predicated region body
PF: predicated region fallthrough
CT: control target
= control target key end

     0   :  { %10 = vsyncpa [#allocation3], 0  ;;  %s429_s0 = inlined_call_operand.hbm [shape: f32[8,32], index: 0, kind: input, shape index: {}]   ;;  %s430_s1 = inlined_call_operand.hbm [shape: f32[8,32], index: 1, kind: input, shape index: {}]   ;;  %s431_s2 = inlined_call_operand.hbm [shape: bf16[32,128], index: 2, kind: input, shape index: {}]   ;;  %s432_s3 = inlined_call_operand.hbm [shape: bf16[32,128], index: 3, kind: input, shape index: {}]   ;;  %s433_s4 = inlined_call_operand.vmem [shape: f32[1,128], index: 4, kind: input, shape index: {}]   ;;  %s434_s5 = inlined_call_operand.hbm [shape: f32[8,128], index: 5, kind: output, shape index: {}]  }
   0x1   :  { %11 = vsyncpa [#allocation6], 0 }
   0x2   :  { %12 = vsyncpa [#allocation9], 0 }
   0x3   :  { %13 = vsyncpa [#allocation4], 0  ;;  %s372_s18 = smov [#allocation5]   ;;  %s373_s20 = smov [#allocation2]  }
   0x4   :  { %s30_s19 = sshll.u32 %s372_s18, 4  ;;  %s20_s21 = sshll.u32 %s373_s20, 4  ;;  %s31_s19 = int_to_ptr.vmem [resolvable:$true] %s30_s19  ;;  %s21_s21 = int_to_ptr.vmem [resolvable:$true] %s20_s21 }
   0x5   :  { %s272_s22 = scalar_lea.vmem %s31_s19, 128  ;;  %p277_p1 = scmp.lt.s32.totalorder %s31_s19, %s31_s19 }
   0x6   :  { %p273_p0 = scmp.ne.s32.totalorder %s31_s19, %s272_s22  ;;  %p278_p2 = scmp.lt.s32.totalorder %s272_s22, %s272_s22 }
   0x8   :  { %p279_p3 = por %p278_p2, %p277_p1 }
   0xa   :  { %p280_p4 = pnand %p279_p3, %p273_p0 }
   0xc   :  { %283 = shalt.err (!%p280_p4)
}
   0xd   :  { %33 = dma.hbm_to_vmem [thread:$0]  %s430_s1, 128, %s31_s19, [#allocation6]  }
   0xe   :  { %s292_s25 = scalar_lea.vmem %s21_s21, 128  ;;  %p297_p6 = scmp.lt.s32.totalorder %s21_s21, %s21_s21 }
   0xf   :  { %p293_p5 = scmp.ne.s32.totalorder %s21_s21, %s292_s25  ;;  %p298_p7 = scmp.lt.s32.totalorder %s292_s25, %s292_s25 }
  0x11   :  { %p299_p8 = por %p298_p7, %p297_p6 }
  0x13   :  { %p300_p9 = pnand %p299_p8, %p293_p5 }
  0x15   :  { %303 = shalt.err (!%p300_p9)
}
  0x16   :  { %23 = dma.hbm_to_vmem [thread:$0]  %s429_s0, 128, %s21_s21, [#allocation3]  }
  0x17   :  { %s374_s28 = smov [#allocation7]  }
  0x18   :  { %s39_s29 = sshll.u32 %s374_s28, 4  ;;  %s40_s29 = int_to_ptr.vmem [resolvable:$true] %s39_s29 }
  0x19   :  { %s312_s30 = scalar_lea.vmem %s40_s29, 256  ;;  %p317_p11 = scmp.lt.s32.totalorder %s40_s29, %s40_s29 }
  0x1a   :  { %p313_p10 = scmp.ne.s32.totalorder %s40_s29, %s312_s30  ;;  %p318_p12 = scmp.lt.s32.totalorder %s312_s30, %s312_s30 }
  0x1c   :  { %p319_p13 = por %p318_p12, %p317_p11 }
  0x1e   :  { %p320_p0 = pnand %p319_p13, %p313_p10 }
  0x20   :  { %323 = shalt.err (!%p320_p0)
}
  0x21   :  { %s375_s1 = smov 64   ;;  %s376_s6 = smov 4  }
  0x22   :  { %45 = dma.hbm_to_vmem [thread:$0]  %s431_s2, 256, %s40_s29, [#allocation6], %s375_s1, %s375_s1, %s376_s6  }
  0x23   :  { %s377_s9 = smov [#allocation8]  }
  0x24   :  { %s51_s10 = sshll.u32 %s377_s9, 4  ;;  %s52_s10 = int_to_ptr.vmem [resolvable:$true] %s51_s10 }
  0x25   :  { %s332_s0 = scalar_lea.vmem %s52_s10, 256  ;;  %p337_p2 = scmp.lt.s32.totalorder %s52_s10, %s52_s10 }
  0x26   :  { %p333_p1 = scmp.ne.s32.totalorder %s52_s10, %s332_s0  ;;  %p338_p3 = scmp.lt.s32.totalorder %s332_s0, %s332_s0 }
  0x28   :  { %p339_p4 = por %p338_p3, %p337_p2 }
  0x2a   :  { %p340_p5 = pnand %p339_p4, %p333_p1 }
  0x2c   :  { %343 = shalt.err (!%p340_p5)
}
  0x2d   :  { %57 = dma.hbm_to_vmem [thread:$0]  %s432_s3, 256, %s52_s10, [#allocation9], %s375_s1, %s375_s1, %s376_s6  }
  0x2e   :  { %364 = dma.done.wait [#allocation3], 128  }
  0x2f   :  { %365 = vsyncadd [#allocation3], 4294967168 }
  0x30   :  { %366 = dma.done.wait [#allocation6], 384  }
  0x31   :  { %367 = vsyncadd [#allocation6], 4294966912 }
  0x32   :  { %368 = dma.done.wait [#allocation9], 256  }
  0x33   :  { %369 = vsyncadd [#allocation9], 4294967040  ;;  %v378_v0 = vmov 0.0   ;;  %vm379_vm0 = vmmov 0   ;;  %v260_v1 = vld [vmem:[#allocation8 + $0x8] sm:$0xff]   ;;  %v261_v2 = vld [vmem:[#allocation7 + $0x8] sm:$0xff]  }
  0x34   :  { %235 = vmatprep.subr.bf16.mxu0 %v378_v0  ;;  %243 = vmatprep.subr.bf16.mxu1 %v378_v0  ;;  %v262_v3 = vld [vmem:[#allocation8] sm:$0xff]   ;;  %v263_v4 = vld [vmem:[#allocation7] sm:$0xff]   ;;  %v75_v5 = vld [vmem:[#allocation5] sm:$0xff]  ;;  %vm97_vm1 = vcmask 261120   ;;  %s380_s13 = smov [#allocation10]  }
  0x35   :  { %239 = vmatprep.mubr.msk.bf16.mxu0 %vm379_vm0, %v378_v0  ;;  %247 = vmatprep.mubr.msk.bf16.mxu1 %vm379_vm0, %v378_v0  ;;  %v73_v6 = vld [vmem:[#allocation2] sm:$0xff]  ;;  %v76_v7 = vpack.c.bf16 %v75_v5, %v75_v5  ;;  %s211_s14 = sshll.u32 %s380_s13, 4  ;;  %s212_s14 = int_to_ptr.vmem [resolvable:$true] %s211_s14 }
  0x36   :  { %236 = vmatpush3.bf16.msra.mxu0 %v260_v1  ;;  %244 = vmatpush3.bf16.msra.mxu1 %v261_v2  ;;  %v74_v8 = vpack.c.bf16 %v73_v6, %v73_v6  ;;  %v228_v11 = vld [vmem:[%s433_s4] ss:$0 sm:$0xff]  ;;  %s344_s15 = scalar_lea.vmem %s212_s14, 128  ;;  %p349_p7 = scmp.lt.s32.totalorder %s212_s14, %s212_s14 }
  0x37   :  { %237 = vmatprep.subr.bf16.mxu0 %v378_v0  ;;  %245 = vmatprep.subr.bf16.mxu1 %v378_v0  ;;  %p345_p6 = scmp.ne.s32.totalorder %s212_s14, %s344_s15  ;;  %p350_p8 = scmp.lt.s32.totalorder %s344_s15, %s344_s15 }
  0x39   :  { %p351_p9 = por %p350_p8, %p349_p7 }
  0x3a   :  { %238 = vmatpush3.bf16.msra.mxu0 %v262_v3  ;;  %246 = vmatpush3.bf16.msra.mxu1 %v263_v4 }
  0x3b   :  { %p352_p10 = pnand %p351_p9, %p345_p6 }
  0x3d   :  { %240 = vmatmul.mubr.msk.bf16.vlgmr.msra.gmra.mxu0 %vm97_vm1, %v76_v7  ;;  %248 = vmatmul.mubr.msk.bf16.vlgmr.msra.gmra.mxu1 %vm97_vm1, %v74_v8 }
  0xfd   :  { %v135_v9 = vpop.f32.mrf.mxu0  ;;  %v190_v10 = vpop.f32.mrf.mxu1 }
  0xfe   :  { %v191_v12 = vadd.f32 %v190_v10, %v135_v9 }
  0xff   :  { %v241_v13 = vpop.f32.mrf.mxu0  ;;  %v249_v14 = vpop.f32.mrf.mxu1 }
 0x100   :  { %v203_v15 = vadd.f32 %v228_v11, %v191_v12 }
 0x101   :  { %v138_v16 = vpop.f32.mrf.mxu0  ;;  %v193_v17 = vpop.f32.mrf.mxu1 }
 0x102   :  { %204 = vst [vmem:[#allocation10] sm:$0xff] %v203_v15 }
 0x103   :  { %v242_v18 = vpop.f32.mrf.mxu0  ;;  %v250_v19 = vpop.f32.mrf.mxu1 }
 0x104   :  { %355 = shalt.err (!%p352_p10)
}
 0x105   :  { %214 = dma.vmem_to_hbm [thread:$0]  %s212_s14, 128, %s434_s5, [#allocation4]  }
 0x106   :  { %370 = dma.done.wait [#allocation4], 128  }
 0x107   :  { %371 = vsyncadd [#allocation4], 4294967168 }
 0x108   :  { %218 = vsyncpa [#allocation3], 1 }
 0x109   :  { %219 = vsyncpa [#allocation6], 1 }
 0x10a   :  { %220 = vsyncpa [#allocation9], 1 }
 0x10b   :  { %221 = vsyncpa [#allocation4], 1 }

</bundles_post_ra>
